<compile_context>
chip_gen: v6e
topology: v6e:2x2x1
jax: 0.10.0
libtpu: 0.0.40
codegen_flags: <defaults>
</compile_context>

<pallas_src>
import functools

import jax
import jax.numpy as jnp
from jax import lax
from jax.experimental import pallas as pl
from jax.experimental.pallas import tpu as pltpu


# -----------------------------------------------------------------------------
# Kernel 1: K / V projections   k = x @ Wk + bk,  v = x @ Wv + bv
# -----------------------------------------------------------------------------
def _kv_proj_kernel(x_ref, wk_ref, wv_ref, bk_ref, bv_ref, k_ref, v_ref):
    x = x_ref[...]
    k = jnp.dot(x, wk_ref[...], preferred_element_type=jnp.float32) + bk_ref[...]
    v = jnp.dot(x, wv_ref[...], preferred_element_type=jnp.float32) + bv_ref[...]
    k_ref[...] = k.astype(k_ref.dtype)
    v_ref[...] = v.astype(v_ref.dtype)


def kv_projection(x2d, wk, wv, bk, bv, *, tm=512):
    """x2d: (M, D) -> (k, v), each (M, D). Row-tiled; weights resident in VMEM."""
    M, D = x2d.shape
    tm = M if M <= tm else tm                      # tm is a multiple of 8 when tiling
    grid = (pl.cdiv(M, tm),)
    return pl.pallas_call(
        _kv_proj_kernel,
        out_shape=[jax.ShapeDtypeStruct((M, D), x2d.dtype),
                   jax.ShapeDtypeStruct((M, D), x2d.dtype)],
        grid=grid,
        in_specs=[
            pl.BlockSpec((tm, D), lambda i: (i, 0)),   # x tile (streams)
            pl.BlockSpec((D, D), lambda i: (0, 0)),    # Wk (resident)
            pl.BlockSpec((D, D), lambda i: (0, 0)),    # Wv (resident)
            pl.BlockSpec((1, D), lambda i: (0, 0)),    # bk
            pl.BlockSpec((1, D), lambda i: (0, 0)),    # bv
        ],
        out_specs=[
            pl.BlockSpec((tm, D), lambda i: (i, 0)),
            pl.BlockSpec((tm, D), lambda i: (i, 0)),
        ],
        compiler_params=pltpu.CompilerParams(dimension_semantics=("parallel",)),
    )(x2d, wk, wv, bk.reshape(1, D), bv.reshape(1, D))


# -----------------------------------------------------------------------------
# Kernel 2: fused  Q-projection + multi-head attention + output projection.
# Grid is (batch, q-tile); all heads handled per grid step via in-register
# lane slices.  Output is written back as one lane-dense (tq, D) slab.
# -----------------------------------------------------------------------------
def _attn_out_kernel(x_ref, k_ref, v_ref, wq_ref, bq_ref, wo_ref, bo_ref, o_ref,
                     *, n_head, head_dim, inv_scale):
    # x_ref: (1, tq, D)   k_ref/v_ref: (1, S, D)
    # wq/wo: (D, D)       bq/bo: (1, D)        o_ref: (1, tq, D)
    x = x_ref[0, :, :]                                           # (tq, D)
    q_all = (jnp.dot(x, wq_ref[...], preferred_element_type=jnp.float32)
             + bq_ref[...]) * inv_scale                          # (tq, D) f32, scale folded in

    parts = []
    for h in range(n_head):                                      # static unroll over heads
        lo = h * head_dim
        q = q_all[:, lo:lo + head_dim]                           # (tq, hd) f32
        k = k_ref[0, :, lo:lo + head_dim]                        # (S,  hd)
        v = v_ref[0, :, lo:lo + head_dim]                        # (S,  hd)

        # Q K^T as a direct contraction of the last dims (no K^T relayout).
        s = lax.dot_general(q, k, (((1,), (1,)), ((), ())),
                            preferred_element_type=jnp.float32)  # (tq, S)

        # numerically-stable softmax; normalize after P@V (fewer scaled elems).
        m = jnp.max(s, axis=-1, keepdims=True)
        p = jnp.exp(s - m)
        denom = jnp.sum(p, axis=-1, keepdims=True)
        ctx = jnp.dot(p.astype(v.dtype), v,
                      preferred_element_type=jnp.float32)        # (tq, hd)
        parts.append(ctx / denom)

    ctx_full = jnp.concatenate(parts, axis=-1)                   # (tq, D) merged heads
    out = jnp.dot(ctx_full.astype(wo_ref.dtype), wo_ref[...],
                  preferred_element_type=jnp.float32) + bo_ref[...]
    o_ref[0, :, :] = out.astype(o_ref.dtype)                     # single lane-dense store


def attention_output(x, k, v, wq, bq, wo, bo, n_head, *, tq=256):
    """x/k/v: (B, S, D) -> out: (B, S, D) (fused attention + fc_concat)."""
    B, S, D = x.shape
    head_dim = D // n_head
    inv_scale = 1.0 / (float(head_dim) ** 0.5)
    tq = S if S <= tq else tq                      # tq multiple of 8 when tiling
    grid = (B, pl.cdiv(S, tq))
    kern = functools.partial(_attn_out_kernel, n_head=n_head,
                             head_dim=head_dim, inv_scale=inv_scale)
    return pl.pallas_call(
        kern,
        out_shape=jax.ShapeDtypeStruct((B, S, D), x.dtype),
        grid=grid,
        in_specs=[
            pl.BlockSpec((1, tq, D), lambda b, qi: (b, qi, 0)),  # x tile  (streams)
            pl.BlockSpec((1, S, D), lambda b, qi: (b, 0, 0)),    # K (full S per batch)
            pl.BlockSpec((1, S, D), lambda b, qi: (b, 0, 0)),    # V (full S per batch)
            pl.BlockSpec((D, D), lambda b, qi: (0, 0)),          # Wq (resident)
            pl.BlockSpec((1, D), lambda b, qi: (0, 0)),          # bq
            pl.BlockSpec((D, D), lambda b, qi: (0, 0)),          # Wo (resident)
            pl.BlockSpec((1, D), lambda b, qi: (0, 0)),          # bo
        ],
        out_specs=pl.BlockSpec((1, tq, D), lambda b, qi: (b, qi, 0)),
        compiler_params=pltpu.CompilerParams(
            dimension_semantics=("parallel", "parallel")),
    )(x, k, v, wq, bq.reshape(1, D), wo, bo.reshape(1, D))


# -----------------------------------------------------------------------------
# Module wrapper (parameter container + forward)
# -----------------------------------------------------------------------------
class MultiHeadAttentionCFPallas:
    """Pallas-TPU port of MultiHeadAttention_CF (inference; dropout = identity)."""

    def __init__(self, d_model, n_head, drop_prob, key):
        assert d_model % n_head == 0
        self.d_model = d_model
        self.n_head = n_head
        self.head_dim = d_model // n_head
        self.drop_prob = drop_prob        # TODO(synk): dropout unused (inference).

        ks = jax.random.split(key, 8)
        bound = 1.0 / (d_model ** 0.5)    # nn.Linear default init range

        def init_linear(kw, kb):
            w = jax.random.uniform(kw, (d_model, d_model), jnp.float32,
                                   minval=-bound, maxval=bound)
            b = jax.random.uniform(kb, (d_model,), jnp.float32,
                                   minval=-bound, maxval=bound)
            return w, b                   # stored pre-transposed: (d_in, d_out)

        self.wq, self.bq = init_linear(ks[0], ks[1])
        self.wk, self.bk = init_linear(ks[2], ks[3])
        self.wv, self.bv = init_linear(ks[4], ks[5])
        self.wo, self.bo = init_linear(ks[6], ks[7])

    def __call__(self, x):
        B, S, D = x.shape
        # Kernel 1: K/V projections (row-tiled; weights resident in VMEM).
        k, v = kv_projection(x.reshape(B * S, D), self.wk, self.wv,
                             self.bk, self.bv)
        k = k.reshape(B, S, D)            # contiguous (free) reshapes
        v = v.reshape(B, S, D)
        # Kernel 2: Q projection + attention + fc_concat, fused.
        return attention_output(x, k, v, self.wq, self.bq,
                                self.wo, self.bo, self.n_head)


# -----------------------------------------------------------------------------
# Pure-JAX reference (mirrors the PyTorch forward) for a sanity check
# -----------------------------------------------------------------------------
def reference_forward(m, x):
    B, S, D = x.shape
    H, hd = m.n_head, m.head_dim
    q = x.reshape(B * S, D) @ m.wq + m.bq
    k = x.reshape(B * S, D) @ m.wk + m.bk
    v = x.reshape(B * S, D) @ m.wv + m.bv
    q = q.reshape(B, S, H, hd).transpose(0, 2, 1, 3)
    k = k.reshape(B, S, H, hd).transpose(0, 2, 1, 3)
    v = v.reshape(B, S, H, hd).transpose(0, 2, 1, 3)
    scores = jnp.einsum("bhqd,bhkd->bhqk", q, k) / jnp.sqrt(jnp.float32(hd))
    attn = jax.nn.softmax(scores, axis=-1)
    ctx = jnp.einsum("bhqk,bhkd->bhqd", attn, v)
    ctx = ctx.transpose(0, 2, 1, 3).reshape(B * S, D)
    return (ctx @ m.wo + m.bo).reshape(B, S, D)


if __name__ == "__main__":
    key = jax.random.PRNGKey(0)
    k_param, k_x = jax.random.split(key)

    batch, seq, d_model, n_head = 2, 8, 32, 4
    mha = MultiHeadAttentionCFPallas(d_model, n_head, drop_prob=0.1, key=k_param)

    x = jax.random.normal(k_x, (batch, seq, d_model), jnp.float32)

    out = mha(x)
    jax.block_until_ready(out)

    ref = reference_forward(mha, x)
    assert out.shape == (batch, seq, d_model)
    assert jnp.allclose(out, ref, atol=2e-3, rtol=2e-3), float(
        jnp.max(jnp.abs(out - ref)))

    print("KERNEL_OK")
</pallas_src>

<mosaic_0001>
module attributes {stable_mosaic.version = 11 : i64} {
  func.func @_kv_proj_kernel(%arg0: i32, %arg1: memref<16x32xf32, #tpu.memory_space<vmem>>, %arg2: memref<32x32xf32, #tpu.memory_space<vmem>>, %arg3: memref<32x32xf32, #tpu.memory_space<vmem>>, %arg4: memref<1x32xf32, #tpu.memory_space<vmem>>, %arg5: memref<1x32xf32, #tpu.memory_space<vmem>>, %arg6: memref<16x32xf32, #tpu.memory_space<vmem>>, %arg7: memref<16x32xf32, #tpu.memory_space<vmem>>) attributes {dimension_semantics = [#tpu.dimension_semantics<parallel>], iteration_bounds = array<i64: 1>, scalar_prefetch = 0 : i64, scratch_operands = 0 : i64, tpu.core_type = #tpu.core_type<tc>, window_params = [{transform_indices = @transform_0, window_bounds = array<i64: 16, 32>}, {pipeline_mode = #tpu.pipeline_mode<synchronous>, transform_indices = @transform_1, window_bounds = array<i64: 32, 32>}, {pipeline_mode = #tpu.pipeline_mode<synchronous>, transform_indices = @transform_2, window_bounds = array<i64: 32, 32>}, {pipeline_mode = #tpu.pipeline_mode<synchronous>, transform_indices = @transform_3, window_bounds = array<i64: 1, 32>}, {pipeline_mode = #tpu.pipeline_mode<synchronous>, transform_indices = @transform_4, window_bounds = array<i64: 1, 32>}, {transform_indices = @transform_5, window_bounds = array<i64: 16, 32>}, {transform_indices = @transform_6, window_bounds = array<i64: 16, 32>}]} {
    %c0 = arith.constant 0 : index
    %c0_0 = arith.constant 0 : index
    %0 = vector.load %arg1[%c0, %c0_0] : memref<16x32xf32, #tpu.memory_space<vmem>>, vector<16x32xf32>
    %c0_1 = arith.constant 0 : index
    %c0_2 = arith.constant 0 : index
    %1 = vector.load %arg2[%c0_1, %c0_2] : memref<32x32xf32, #tpu.memory_space<vmem>>, vector<32x32xf32>
    %cst = arith.constant dense<0.000000e+00> : vector<16x32xf32>
    %2 = tpu.matmul %0, %1, %cst {dimension_numbers = #tpu.dot_dimension_numbers<[1], [0], [0], [1], [0, 0, 1, 1], [], []>} : vector<16x32xf32>, vector<32x32xf32>, vector<16x32xf32> -> vector<16x32xf32>
    %c0_3 = arith.constant 0 : index
    %c0_4 = arith.constant 0 : index
    %3 = vector.load %arg4[%c0_3, %c0_4] : memref<1x32xf32, #tpu.memory_space<vmem>>, vector<1x32xf32>
    %4 = vector.broadcast %3 : vector<1x32xf32> to vector<16x32xf32>
    %5 = arith.addf %2, %4 : vector<16x32xf32>
    %c0_5 = arith.constant 0 : index
    %c0_6 = arith.constant 0 : index
    %6 = vector.load %arg3[%c0_5, %c0_6] : memref<32x32xf32, #tpu.memory_space<vmem>>, vector<32x32xf32>
    %cst_7 = arith.constant dense<0.000000e+00> : vector<16x32xf32>
    %7 = tpu.matmul %0, %6, %cst_7 {dimension_numbers = #tpu.dot_dimension_numbers<[1], [0], [0], [1], [0, 0, 1, 1], [], []>} : vector<16x32xf32>, vector<32x32xf32>, vector<16x32xf32> -> vector<16x32xf32>
    %c0_8 = arith.constant 0 : index
    %c0_9 = arith.constant 0 : index
    %8 = vector.load %arg5[%c0_8, %c0_9] : memref<1x32xf32, #tpu.memory_space<vmem>>, vector<1x32xf32>
    %9 = vector.broadcast %8 : vector<1x32xf32> to vector<16x32xf32>
    %10 = arith.addf %7, %9 : vector<16x32xf32>
    %c0_10 = arith.constant 0 : index
    %c0_11 = arith.constant 0 : index
    %11 = vector.load %arg6[%c0_10, %c0_11] : memref<16x32xf32, #tpu.memory_space<vmem>>, vector<16x32xf32>
    tpu.vector_store %arg6[%c0_10, %c0_11], %5 {strides = array<i32>} : memref<16x32xf32, #tpu.memory_space<vmem>>, vector<16x32xf32>,
    %c0_12 = arith.constant 0 : index
    %c0_13 = arith.constant 0 : index
    %12 = vector.load %arg7[%c0_12, %c0_13] : memref<16x32xf32, #tpu.memory_space<vmem>>, vector<16x32xf32>
    tpu.vector_store %arg7[%c0_12, %c0_13], %10 {strides = array<i32>} : memref<16x32xf32, #tpu.memory_space<vmem>>, vector<16x32xf32>,
    return
  }
  func.func @transform_0(%arg0: i32) -> (i32, i32) {
    %c0_i32 = arith.constant 0 : i32
    %c0_i32_0 = arith.constant 0 : i32
    return %arg0, %c0_i32 : i32, i32
  }
  func.func @transform_1(%arg0: i32) -> (i32, i32) {
    %c0_i32 = arith.constant 0 : i32
    %c0_i32_0 = arith.constant 0 : i32
    %c0_i32_1 = arith.constant 0 : i32
    return %c0_i32, %c0_i32_0 : i32, i32
  }
  func.func @transform_2(%arg0: i32) -> (i32, i32) {
    %c0_i32 = arith.constant 0 : i32
    %c0_i32_0 = arith.constant 0 : i32
    %c0_i32_1 = arith.constant 0 : i32
    return %c0_i32, %c0_i32_0 : i32, i32
  }
  func.func @transform_3(%arg0: i32) -> (i32, i32) {
    %c0_i32 = arith.constant 0 : i32
    %c0_i32_0 = arith.constant 0 : i32
    %c0_i32_1 = arith.constant 0 : i32
    return %c0_i32, %c0_i32_0 : i32, i32
  }
  func.func @transform_4(%arg0: i32) -> (i32, i32) {
    %c0_i32 = arith.constant 0 : i32
    %c0_i32_0 = arith.constant 0 : i32
    %c0_i32_1 = arith.constant 0 : i32
    return %c0_i32, %c0_i32_0 : i32, i32
  }
  func.func @transform_5(%arg0: i32) -> (i32, i32) {
    %c0_i32 = arith.constant 0 : i32
    %c0_i32_0 = arith.constant 0 : i32
    return %arg0, %c0_i32 : i32, i32
  }
  func.func @transform_6(%arg0: i32) -> (i32, i32) {
    %c0_i32 = arith.constant 0 : i32
    %c0_i32_0 = arith.constant 0 : i32
    return %arg0, %c0_i32 : i32, i32
  }
}

</mosaic_0001>

<bundles_post_ra>
// kernel: tpu_custom_call.1
= control target key start
LH: loop header
LB: loop body
LE: loop exit
PB: predicated region body
PF: predicated region fallthrough
CT: control target
= control target key end

     0   :  { %12 = vsyncpa [#allocation3], 0  ;;  %s525_s0 = inlined_call_operand.hbm [shape: f32[16,32], index: 0, kind: input, shape index: {}]   ;;  %s526_s1 = inlined_call_operand.hbm [shape: f32[32,32], index: 1, kind: input, shape index: {}]   ;;  %s527_s2 = inlined_call_operand.hbm [shape: f32[32,32], index: 2, kind: input, shape index: {}]   ;;  %s528_s3 = inlined_call_operand.vmem [shape: f32[1,32], index: 3, kind: input, shape index: {}]   ;;  %s529_s4 = inlined_call_operand.vmem [shape: f32[1,32], index: 4, kind: input, shape index: {}]   ;;  %s530_s5 = inlined_call_operand.hbm [shape: f32[16,32], index: 5, kind: output, shape index: {0}]   ;;  %s531_s6 = inlined_call_operand.hbm [shape: f32[16,32], index: 6, kind: output, shape index: {1}]  }
   0x1   :  { %13 = vsyncpa [#allocation6], 0 }
   0x2   :  { %14 = vsyncpa [#allocation4], 0 }
   0x3   :  { %15 = vsyncpa [#allocation10], 0  ;;  %s439_s21 = smov [#allocation5]   ;;  %s440_s23 = smov [#allocation2]  }
   0x4   :  { %s33_s22 = sshll.u32 %s439_s21, 4  ;;  %s21_s24 = sshll.u32 %s440_s23, 4  ;;  %s34_s22 = int_to_ptr.vmem [resolvable:$true] %s33_s22  ;;  %s22_s24 = int_to_ptr.vmem [resolvable:$true] %s21_s24 }
   0x5   :  { %s339_s25 = scalar_lea.vmem %s34_s22, 512  ;;  %p344_p1 = scmp.lt.s32.totalorder %s34_s22, %s34_s22 }
   0x6   :  { %p340_p0 = scmp.ne.s32.totalorder %s34_s22, %s339_s25  ;;  %p345_p2 = scmp.lt.s32.totalorder %s339_s25, %s339_s25 }
   0x8   :  { %p346_p3 = por %p345_p2, %p344_p1 }
   0xa   :  { %p347_p4 = pnand %p346_p3, %p340_p0 }
   0xc   :  { %350 = shalt.err (!%p347_p4)
}
   0xd   :  { %s441_s26 = smov 128   ;;  %s442_s27 = smov 8  }
   0xe   :  { %39 = dma.hbm_to_vmem [thread:$0]  %s526_s1, 512, %s34_s22, [#allocation6], %s441_s26, %s441_s26, %s442_s27  }
   0xf   :  { %s359_s30 = scalar_lea.vmem %s22_s24, 256  ;;  %p364_p6 = scmp.lt.s32.totalorder %s22_s24, %s22_s24 }
  0x10   :  { %p360_p5 = scmp.ne.s32.totalorder %s22_s24, %s359_s30  ;;  %p365_p7 = scmp.lt.s32.totalorder %s359_s30, %s359_s30 }
  0x12   :  { %p366_p8 = por %p365_p7, %p364_p6 }
  0x14   :  { %p367_p9 = pnand %p366_p8, %p360_p5 }
  0x16   :  { %370 = shalt.err (!%p367_p9)
}
  0x17   :  { %27 = dma.hbm_to_vmem [thread:$0]  %s525_s0, 256, %s22_s24, [#allocation3], %s441_s26, %s441_s26, %s442_s27  }
  0x18   :  { %s443_s9 = smov [#allocation7]  }
  0x19   :  { %s45_s10 = sshll.u32 %s443_s9, 4  ;;  %s46_s10 = int_to_ptr.vmem [resolvable:$true] %s45_s10 }
  0x1a   :  { %s379_s11 = scalar_lea.vmem %s46_s10, 512  ;;  %p384_p11 = scmp.lt.s32.totalorder %s46_s10, %s46_s10 }
  0x1b   :  { %p380_p10 = scmp.ne.s32.totalorder %s46_s10, %s379_s11  ;;  %p385_p12 = scmp.lt.s32.totalorder %s379_s11, %s379_s11 }
  0x1d   :  { %p386_p13 = por %p385_p12, %p384_p11 }
  0x1f   :  { %p387_p0 = pnand %p386_p13, %p380_p10 }
  0x21   :  { %390 = shalt.err (!%p387_p0)
}
  0x22   :  { %51 = dma.hbm_to_vmem [thread:$0]  %s527_s2, 512, %s46_s10, [#allocation6], %s441_s26, %s441_s26, %s442_s27  }
  0x23   :  { %431 = dma.done.wait [#allocation3], 256  }
  0x24   :  { %432 = vsyncadd [#allocation3], 4294967040 }
  0x25   :  { %433 = dma.done.wait [#allocation6], 1024  }
  0x26   :  { %434 = vsyncadd [#allocation6], 4294966272  ;;  %v70_v0 = vld [vmem:[#allocation5 + $0x18] sm:$0xff]  ;;  %v69_v2 = vld [vmem:[#allocation5 + $0x10] sm:$0xff]  ;;  %vm78_vm0 = vcmask 261120   ;;  %s444_s15 = smov [#allocation8]  }
  0x27   :  { %v163_v1 = vld [vmem:[#allocation7 + $0x18] sm:$0xff]  ;;  %302 = vmatprep.subr.mxu0 %v70_v0  ;;  %v162_v3 = vld [vmem:[#allocation7 + $0x10] sm:$0xff]  ;;  %v68_v4 = vld [vmem:[#allocation5 + $0x8] sm:$0xff]  ;;  %s255_s16 = sshll.u32 %s444_s15, 4  ;;  %s445_s17 = smov [#allocation9]   ;;  %s256_s16 = int_to_ptr.vmem [resolvable:$true] %s255_s16 }
  0x28   :  { %313 = vmatprep.subr.mxu1 %v163_v1  ;;  %303 = vmatpush3.msra.mxu0 %v70_v0  ;;  %v161_v5 = vld [vmem:[#allocation7 + $0x8] sm:$0xff]  ;;  %v67_v6 = vld [vmem:[#allocation5] sm:$0xff]  ;;  %v65_v8 = vld [vmem:[#allocation2] sm:$0xff]  ;;  %s267_s18 = sshll.u32 %s445_s17, 4  ;;  %p396_p2 = scmp.lt.s32.totalorder %s256_s16, %s256_s16  ;;  %s268_s18 = int_to_ptr.vmem [resolvable:$true] %s267_s18 }
  0x29   :  { %314 = vmatpush3.msra.mxu1 %v163_v1  ;;  %304 = vmatprep.subr.mxu0 %v69_v2  ;;  %v160_v7 = vld [vmem:[#allocation7] sm:$0xff]  ;;  %v66_v9 = vld [vmem:[#allocation2 + $0x8] sm:$0xff]  ;;  %v284_v10 = vld [vmem:[%s528_s3] ss:$0 sm:$0xff]  ;;  %s391_s3 = scalar_lea.vmem %s256_s16, 256 }
  0x2a   :  { %315 = vmatprep.subr.mxu1 %v162_v3  ;;  %305 = vmatpush3.msra.mxu0 %v69_v2  ;;  %v287_v11 = vld [vmem:[%s529_s4] ss:$0 sm:$0xff]  ;;  %p392_p1 = scmp.ne.s32.totalorder %s256_s16, %s391_s3  ;;  %p397_p3 = scmp.lt.s32.totalorder %s391_s3, %s391_s3 }
  0x2b   :  { %316 = vmatpush3.msra.mxu1 %v162_v3  ;;  %306 = vmatprep.subr.mxu0 %v68_v4 }
  0x2c   :  { %317 = vmatprep.subr.mxu1 %v161_v5  ;;  %307 = vmatpush3.msra.mxu0 %v68_v4  ;;  %p398_p4 = por %p397_p3, %p396_p2 }
  0x2d   :  { %318 = vmatpush3.msra.mxu1 %v161_v5  ;;  %308 = vmatprep.subr.mxu0 %v67_v6 }
  0x2e   :  { %319 = vmatprep.subr.mxu1 %v160_v7  ;;  %309 = vmatpush3.msra.mxu0 %v67_v6  ;;  %p399_p5 = pnand %p398_p4, %p392_p1 }
  0x2f   :  { %310 = vmatprep.mubr.msk.f32.mxu0 %vm78_vm0, %v65_v8  ;;  %320 = vmatpush3.msra.mxu1 %v160_v7 }
  0x30   :  { %321 = vmatprep.mubr.msk.f32.mxu1 %vm78_vm0, %v65_v8  ;;  %311 = vmatmul.mubr.msk.f32.vlgmr.msra.gmra.mxu0 %vm78_vm0, %v66_v9 }
  0x31   :  { %322 = vmatmul.mubr.msk.f32.vlgmr.msra.gmra.mxu1 %vm78_vm0, %v66_v9 }
  0xf0   :  { %v312_v12 = vpop.f32.mrf.mxu0 }
  0xf1   :  { %v323_v13 = vpop.f32.mrf.mxu1  ;;  %v157_v14 = vadd.f32 %v312_v12, %v284_v10 }
  0xf2   :  { %v243_v15 = vadd.f32 %v323_v13, %v287_v11  ;;  %v151_v16 = vpop.f32.mrf.mxu0 }
  0xf3   :  { %v237_v17 = vpop.f32.mrf.mxu1  ;;  %247 = vst.msk [vmem:[#allocation8 + $0x8] sm:$0xff] %vm78_vm0, %v157_v14  ;;  %v152_v18 = vadd.f32 %v284_v10, %v151_v16 }
  0xf4   :  { %249 = vst.msk [vmem:[#allocation9 + $0x8] sm:$0xff] %vm78_vm0, %v243_v15  ;;  %v238_v19 = vadd.f32 %v287_v11, %v237_v17 }
  0xf5   :  { %246 = vst.msk [vmem:[#allocation8] sm:$0xff] %vm78_vm0, %v152_v18 }
  0xf6   :  { %248 = vst.msk [vmem:[#allocation9] sm:$0xff] %vm78_vm0, %v238_v19 }
  0xf7   :  { %402 = shalt.err (!%p399_p5)
}
  0xf8   :  { %261 = dma.vmem_to_hbm [thread:$0]  %s256_s16, 256, %s530_s5, [#allocation4], %s441_s26, %s441_s26, %s442_s27  }
  0xf9   :  { %s411_s20 = scalar_lea.vmem %s268_s18, 256  ;;  %p416_p7 = scmp.lt.s32.totalorder %s268_s18, %s268_s18 }
  0xfa   :  { %p412_p6 = scmp.ne.s32.totalorder %s268_s18, %s411_s20  ;;  %p417_p8 = scmp.lt.s32.totalorder %s411_s20, %s411_s20 }
  0xfc   :  { %p418_p9 = por %p417_p8, %p416_p7 }
  0xfe   :  { %p419_p10 = pnand %p418_p9, %p412_p6 }
 0x100   :  { %422 = shalt.err (!%p419_p10)
}
 0x101   :  { %273 = dma.vmem_to_hbm [thread:$0]  %s268_s18, 256, %s531_s6, [#allocation10], %s441_s26, %s441_s26, %s442_s27  }
 0x102   :  { %435 = dma.done.wait [#allocation4], 256  }
 0x103   :  { %436 = vsyncadd [#allocation4], 4294967040 }
 0x104   :  { %437 = dma.done.wait [#allocation10], 256  }
 0x105   :  { %438 = vsyncadd [#allocation10], 4294967040 }
 0x106   :  { %280 = vsyncpa [#allocation3], 1 }
 0x107   :  { %281 = vsyncpa [#allocation6], 1 }
 0x108   :  { %282 = vsyncpa [#allocation4], 1 }
 0x109   :  { %283 = vsyncpa [#allocation10], 1 }

</bundles_post_ra>
